<compile_context>
chip_gen: v5e
topology: v5e:2x2
jax: 0.10.0
libtpu: 0.0.40
codegen_flags: <defaults>
</compile_context>

<pallas_src>
import jax
import jax.numpy as jnp
from jax.experimental import pallas as pl
from jax.experimental.pallas import tpu as pltpu


# --------------------------------------------------------------------------- #
# Kernel
# --------------------------------------------------------------------------- #
def attention_kernel(enc_ref, wenc_ref, out_ref):
    """Processes one (bt, S, H) tile of encoder outputs.

    Both contractions use the flash-attention batched-einsum pattern so the
    reductions run on the MXU and no (bt, S, H) temporaries are created.
    """
    e = enc_ref[...]                                        # (bt, S, H) f32
    bt, S, H = e.shape
    w_b = jnp.broadcast_to(wenc_ref[...].reshape(1, 1, H), (bt, 1, H))

    # logits[b, s] = sum_h w_enc[h] * enc[b, s, h]          (MXU)
    logits = jnp.einsum("bqh,bsh->bqs", w_b, e,
                        preferred_element_type=jnp.float32)[:, 0, :]   # (bt, S)

    # Numerically-stable softmax over seq_len; reciprocal routed to the EUP.
    m = jnp.max(logits, axis=-1, keepdims=True)
    p = jnp.exp(logits - m)
    denom = jnp.sum(p, axis=-1, keepdims=True)
    attn = p * pl.reciprocal(denom, approx=True)                        # (bt, S)

    # context[b, :] = sum_s attn[b, s] * enc[b, s, :]       (MXU)
    ctx = jnp.einsum("bqs,bsh->bqh", attn[:, None, :], e,
                     preferred_element_type=jnp.float32)[:, 0, :]       # (bt, H)
    # Note: with H < 128 this store is a masked vst; it is bt*H elements vs the
    # bt*S*H streamed, i.e. negligible. Production H % 128 == 0 gets dense vst.
    out_ref[...] = ctx.astype(out_ref.dtype)


# --------------------------------------------------------------------------- #
# Parameter folding (affine chain -> one H-vector + per-batch constant)
# --------------------------------------------------------------------------- #
def _fold_params(params):
    """Collapse linear1..linear4 + to_weight into (w_enc, w_hid, c).

    logits = x0 @ (W1 W2 W3 W4 wto^T) + (b1 W2 W3 W4 wto^T + b2 W3 W4 wto^T
                                          + b3 W4 wto^T + b4 wto^T)
    with x0 = [enc ; hid] and weights stored as (in_features, out_features).
    """
    (w1, b1, w2, b2, w3, b3, w4, b4, wto) = params
    H = w2.shape[0]
    v1 = wto.reshape(-1, 1)                      # (H, 1) = to_weight^T
    v2 = w4 @ v1                                 # (H, 1)
    v3 = w3 @ v2                                 # (H, 1)
    v4 = w2 @ v3                                 # (H, 1)
    w_all = w1 @ v4                              # (2H, 1)
    c = b1 @ v4 + b2 @ v3 + b3 @ v2 + b4 @ v1    # (1, 1)
    w_enc = w_all[:H].reshape(1, H)
    w_hid = w_all[H:].reshape(1, H)
    return w_enc, w_hid, c


# --------------------------------------------------------------------------- #
# Tiling / VMEM budgeting
# --------------------------------------------------------------------------- #
def _round_up(x, m):
    return -(-x // m) * m


def _vmem_budget_bytes():
    """Per-TensorCore VMEM budget with headroom below physical capacity.

    v5e/v6e: 128 MiB physical -> 96 MiB; v7x: 64 MiB physical -> 48 MiB.
    Falls back to the conservative 48 MiB if the hardware query is unavailable.
    """
    phys = 64 * 1024 * 1024
    try:
        info = pltpu.get_tpu_info()
        phys = int(getattr(info, "vmem_capacity_bytes", phys)) or phys
    except Exception:
        pass
    return min(phys * 3 // 4, 100 * 1024 * 1024)


def _pick_block_batch(B, S, H, budget_bytes):
    """Batch rows per grid step: largest padding-aware tile that fits the VMEM
    budget, targeting a multi-MiB encoder slab (HBM-stream roofline plateau),
    with 8-aligned blocks and >= 2 grid steps for large batches (megacore)."""
    itemsize = 4
    pS = _round_up(S, 8)          # sublane padding of the seq axis
    pH = _round_up(H, 128)        # lane padding of the feature axis
    # Padded VMEM bytes that scale with bt:
    #   2x double-buffered encoder tile, einsum temporaries ((bt,1,H) weight
    #   broadcast + (bt,1,H) context, (bt,1,S)/(bt,S) softmax temps), and the
    #   double-buffered output tile.
    per_bt = itemsize * (2 * pS * pH + 2 * 8 * pH + 4 * max(pS, 128) + 2 * pH)
    usable = max(per_bt, int(budget_bytes * 0.85) - (512 << 10))
    bt_vmem = max(1, usable // per_bt)

    # ~8 MiB of useful encoder bytes per step is past the measured ~86% plateau.
    bt_target = max(8, (8 << 20) // max(itemsize * S * H, 1))

    bt = max(1, min(bt_vmem, bt_target))
    if bt >= B:
        if B >= 16:
            # Keep >= 2 grid steps so the 'parallel' batch axis can shard across
            # v7x's two TensorCores while tiles stay multi-row.
            bt = max(8, ((B + 1) // 2) // 8 * 8)
        else:
            bt = B                 # single full-batch tile; out block = full dims
    else:
        bt = max(8, (bt // 8) * 8)  # keep the out-spec second-minor dim 8-aligned
        bt = min(bt, B)
    return bt


# --------------------------------------------------------------------------- #
# Wrapper
# --------------------------------------------------------------------------- #
def attention_pallas(hidden_state, encoder_outputs, params, *, block_batch=None):
    """Forward pass of the PyTorch `Attention` module.

    `hidden_state` is accepted for API fidelity; its logit contribution is
    constant over the sequence axis and cancels exactly under the softmax, so
    it is not streamed through the kernel.
    """
    del hidden_state  # shift-invariance of softmax: contribution cancels exactly
    B, S, H = encoder_outputs.shape
    w_enc, _w_hid, _c = _fold_params(params)

    budget = _vmem_budget_bytes()
    bt = int(block_batch) if block_batch is not None else _pick_block_batch(B, S, H, budget)
    bt = max(1, min(bt, B))
    grid = pl.cdiv(B, bt)         # partial last tile: OOB rows are per-row
                                  # independent and their writes are discarded.

    return pl.pallas_call(
        attention_kernel,
        out_shape=jax.ShapeDtypeStruct((B, H), jnp.float32),
        grid_spec=pltpu.PrefetchScalarGridSpec(
            num_scalar_prefetch=0,
            grid=(grid,),
            in_specs=[
                pl.BlockSpec((bt, S, H), lambda b: (b, 0, 0)),   # encoder stream
                pl.BlockSpec((1, H), lambda b: (0, 0)),          # folded weight
            ],
            out_specs=pl.BlockSpec((bt, H), lambda b: (b, 0)),
        ),
        compiler_params=pltpu.CompilerParams(
            dimension_semantics=("parallel",),
            vmem_limit_bytes=int(budget)),
    )(encoder_outputs.astype(jnp.float32), w_enc.astype(jnp.float32))


# --------------------------------------------------------------------------- #
# Pure-JAX reference (mirrors the unfused PyTorch forward) and init
# --------------------------------------------------------------------------- #
def attention_ref(hidden_state, encoder_outputs, params):
    (w1, b1, w2, b2, w3, b3, w4, b4, wto) = params
    B, S, H = encoder_outputs.shape
    h = jnp.broadcast_to(hidden_state[:, None, :], (B, S, H))
    x = jnp.concatenate([encoder_outputs, h], axis=-1).reshape(-1, 2 * H)
    x = x @ w1 + b1
    x = x @ w2 + b2
    x = x @ w3 + b3
    x = x @ w4 + b4
    logits = (x @ wto.T).reshape(B, S)
    attn = jax.nn.softmax(logits, axis=1)
    return jnp.einsum("bs,bsh->bh", attn, encoder_outputs)


def init_params(key, H):
    """nn.Linear-style init (uniform +-1/sqrt(fan_in)); weights stored as
    (in_features, out_features)."""
    ks = jax.random.split(key, 9)

    def lin(k, fan_in, fan_out):
        bound = 1.0 / jnp.sqrt(fan_in)
        kw, kb = jax.random.split(k)
        w = jax.random.uniform(kw, (fan_in, fan_out), jnp.float32, -bound, bound)
        b = jax.random.uniform(kb, (1, fan_out), jnp.float32, -bound, bound)
        return w, b

    w1, b1 = lin(ks[0], 2 * H, H)
    w2, b2 = lin(ks[1], H, H)
    w3, b3 = lin(ks[2], H, H)
    w4, b4 = lin(ks[3], H, H)
    bound = 1.0 / jnp.sqrt(H)
    wto = jax.random.uniform(ks[4], (1, H), jnp.float32, -bound, bound)  # no bias
    return (w1, b1, w2, b2, w3, b3, w4, b4, wto)


if __name__ == "__main__":
    # Primary small-shape check (single full-batch tile path).
    B, S, H = 2, 8, 32
    k_h, k_e, k_p = jax.random.split(jax.random.PRNGKey(0), 3)
    hidden_state = jax.random.normal(k_h, (B, H), jnp.float32)
    encoder_outputs = jax.random.normal(k_e, (B, S, H), jnp.float32)
    params = init_params(k_p, H)

    out = jax.block_until_ready(attention_pallas(hidden_state, encoder_outputs, params))
    ref = attention_ref(hidden_state, encoder_outputs, params)
    assert out.shape == (B, H)
    # Tolerance covers the folded accumulation order and the EUP approximate
    # reciprocal in the softmax normalizer (~2^-12 relative error).
    assert jnp.allclose(out, ref, atol=2e-3, rtol=2e-3), "mismatch vs reference (small)"

    # Secondary check: multi-step cdiv grid with 8-aligned blocks and a partial
    # last tile (exercises the boundary path and the megacore-friendly split).
    B2, S2, H2 = 20, 16, 32
    k_h2, k_e2, k_p2 = jax.random.split(jax.random.PRNGKey(1), 3)
    hidden2 = jax.random.normal(k_h2, (B2, H2), jnp.float32)
    enc2 = jax.random.normal(k_e2, (B2, S2, H2), jnp.float32)
    params2 = init_params(k_p2, H2)
    out2 = jax.block_until_ready(attention_pallas(hidden2, enc2, params2))
    ref2 = attention_ref(hidden2, enc2, params2)
    assert jnp.allclose(out2, ref2, atol=2e-3, rtol=2e-3), "mismatch vs reference (tiled)"

    print("KERNEL_OK")
</pallas_src>

<mosaic_0001>
module attributes {stable_mosaic.version = 11 : i64} {
  func.func @attention_kernel(%arg0: i32, %arg1: memref<2x8x32xf32, #tpu.memory_space<vmem>>, %arg2: memref<1x32xf32, #tpu.memory_space<vmem>>, %arg3: memref<2x32xf32, #tpu.memory_space<vmem>>) attributes {dimension_semantics = [#tpu.dimension_semantics<parallel>], iteration_bounds = array<i64: 1>, scalar_prefetch = 0 : i64, scratch_operands = 0 : i64, tpu.core_type = #tpu.core_type<tc>, window_params = [{transform_indices = @transform_0, window_bounds = array<i64: 2, 8, 32>}, {pipeline_mode = #tpu.pipeline_mode<synchronous>, transform_indices = @transform_1, window_bounds = array<i64: 1, 32>}, {transform_indices = @transform_2, window_bounds = array<i64: 2, 32>}]} {
    %c0 = arith.constant 0 : index
    %c0_0 = arith.constant 0 : index
    %c0_1 = arith.constant 0 : index
    %0 = vector.load %arg1[%c0, %c0_0, %c0_1] : memref<2x8x32xf32, #tpu.memory_space<vmem>>, vector<2x8x32xf32>
    %c0_2 = arith.constant 0 : index
    %c0_3 = arith.constant 0 : index
    %1 = vector.load %arg2[%c0_2, %c0_3] : memref<1x32xf32, #tpu.memory_space<vmem>>, vector<1x32xf32>
    %2 = vector.shape_cast %1 : vector<1x32xf32> to vector<1x1x32xf32>
    %3 = vector.shape_cast %2 : vector<1x1x32xf32> to vector<1x1x32xf32>
    %4 = vector.broadcast %3 : vector<1x1x32xf32> to vector<2x1x32xf32>
    "tpu.trace_start"() <{level = 10 : i32, message = "bqh,bsh->bqs"}> : () -> ()
    %cst = arith.constant dense<0.000000e+00> : vector<2x1x8xf32>
    %5 = tpu.matmul %4, %0, %cst {dimension_numbers = #tpu.dot_dimension_numbers<[2], [2], [1], [1], [0, 0, 0, 1, 1, 1], [0], [0]>} : vector<2x1x32xf32>, vector<2x8x32xf32>, vector<2x1x8xf32> -> vector<2x1x8xf32>
    "tpu.trace_stop"() : () -> ()
    %6 = vector.shape_cast %5 : vector<2x1x8xf32> to vector<2x8xf32>
    %cst_4 = arith.constant dense<0xFF800000> : vector<2xf32>
    %7 = vector.multi_reduction <maximumf>, %6, %cst_4 [1] : vector<2x8xf32> to vector<2xf32>
    %8 = vector.shape_cast %7 : vector<2xf32> to vector<2x1xf32>
    %9 = vector.broadcast %8 : vector<2x1xf32> to vector<2x8xf32>
    %10 = arith.subf %6, %9 : vector<2x8xf32>
    %11 = math.exp %10 : vector<2x8xf32>
    %cst_5 = arith.constant dense<0.000000e+00> : vector<2xf32>
    %12 = vector.multi_reduction <add>, %11, %cst_5 [1] : vector<2x8xf32> to vector<2xf32>
    %13 = vector.shape_cast %12 : vector<2xf32> to vector<2x1xf32>
    %14 = tpu.reciprocal %13 {approx = true} : vector<2x1xf32> -> vector<2x1xf32>
    %15 = vector.broadcast %14 : vector<2x1xf32> to vector<2x8xf32>
    %16 = arith.mulf %11, %15 : vector<2x8xf32>
    %17 = vector.shape_cast %16 : vector<2x8xf32> to vector<2x1x8xf32>
    "tpu.trace_start"() <{level = 10 : i32, message = "bqs,bsh->bqh"}> : () -> ()
    %cst_6 = arith.constant dense<0.000000e+00> : vector<2x1x32xf32>
    %18 = tpu.matmul %17, %0, %cst_6 {dimension_numbers = #tpu.dot_dimension_numbers<[2], [1], [1], [2], [0, 0, 0, 1, 1, 2], [0], [0]>} : vector<2x1x8xf32>, vector<2x8x32xf32>, vector<2x1x32xf32> -> vector<2x1x32xf32>
    "tpu.trace_stop"() : () -> ()
    %19 = vector.shape_cast %18 : vector<2x1x32xf32> to vector<2x32xf32>
    %c0_7 = arith.constant 0 : index
    %c0_8 = arith.constant 0 : index
    %20 = vector.load %arg3[%c0_7, %c0_8] : memref<2x32xf32, #tpu.memory_space<vmem>>, vector<2x32xf32>
    tpu.vector_store %arg3[%c0_7, %c0_8], %19 {strides = array<i32>} : memref<2x32xf32, #tpu.memory_space<vmem>>, vector<2x32xf32>,
    return
  }
  func.func @transform_0(%arg0: i32) -> (i32, i32, i32) {
    %c0_i32 = arith.constant 0 : i32
    %c0_i32_0 = arith.constant 0 : i32
    %c0_i32_1 = arith.constant 0 : i32
    return %arg0, %c0_i32, %c0_i32_0 : i32, i32, i32
  }
  func.func @transform_1(%arg0: i32) -> (i32, i32) {
    %c0_i32 = arith.constant 0 : i32
    %c0_i32_0 = arith.constant 0 : i32
    %c0_i32_1 = arith.constant 0 : i32
    return %c0_i32, %c0_i32_0 : i32, i32
  }
  func.func @transform_2(%arg0: i32) -> (i32, i32) {
    %c0_i32 = arith.constant 0 : i32
    %c0_i32_0 = arith.constant 0 : i32
    return %arg0, %c0_i32 : i32, i32
  }
}

</mosaic_0001>

<bundles_post_ra>
// kernel: tpu_custom_call.1
= control target key start
LH: loop header
LB: loop body
LE: loop exit
PB: predicated region body
PF: predicated region fallthrough
CT: control target
= control target key end

     0   :  { %7 = vsyncpa [#allocation3], 0  ;;  %s331_s0 = inlined_call_operand.hbm [shape: f32[2,8,32], index: 0, kind: input, shape index: {}]   ;;  %s332_s1 = inlined_call_operand.hbm [shape: f32[1,32], index: 1, kind: input, shape index: {}]   ;;  %s333_s2 = inlined_call_operand.hbm [shape: f32[2,32], index: 2, kind: output, shape index: {}]  }
   0x1   :  { %8 = vsyncpa [#allocation6], 0 }
   0x2   :  { %9 = vsyncpa [#allocation4], 0  ;;  %s14_s11 = sshll.u32 %s331_s0, 4  ;;  %s297_s12 = smov [#allocation2]   ;;  %s15_s11 = int_to_ptr.hbm [resolvable:$true] %s14_s11 }
   0x3   :  { %s16_s13 = sshll.u32 %s297_s12, 4  ;;  %s28_s16 = sshll.u32 %s332_s1, 4  ;;  %s17_s13 = int_to_ptr.vmem [resolvable:$true] %s16_s13  ;;  %s29_s16 = int_to_ptr.hbm [resolvable:$true] %s28_s16 }
   0x4   :  { %s298_s17 = smov 128   ;;  %s299_s18 = smov 8  }
   0x5   :  { %22 = dma.hbm_to_vmem [thread:$0]  %s15_s11, 256, %s17_s13, [#allocation3], %s298_s17, %s298_s17, %s299_s18  }
   0x6   :  { %s300_s19 = smov [#allocation5]  }
   0x7   :  { %s30_s20 = sshll.u32 %s300_s19, 4  ;;  %s31_s20 = int_to_ptr.vmem [resolvable:$true] %s30_s20 }
   0x8   :  { %33 = dma.hbm_to_vmem [thread:$0]  %s29_s16, 16, %s31_s20, [#allocation6]  }
   0x9   :  { %291 = dma.done.wait [#allocation3], 256  }
   0xa   :  { %292 = vsyncadd [#allocation3], 4294967040 }
   0xb   :  { %293 = dma.done.wait [#allocation6], 16  }
   0xc   :  { %294 = vsyncadd [#allocation6], 4294967280  ;;  %vm45_vm0 = vcmask 261120   ;;  %v43_v0 = vld [vmem:[#allocation2 + $0x8] sm:$0xff]  ;;  %v42_v1 = vld [vmem:[#allocation2] sm:$0xff]  ;;  %vm98_vm1 = vcmask 1041409  }
   0xd   :  { %204 = vmatpush.xpose.msk.msra.mxu1 %vm45_vm0, %v43_v0  ;;  %202 = vmatpush.xpose.msk.msra.mxu0 %vm45_vm0, %v42_v1  ;;  %v44_v2 = vld [vmem:[#allocation5] sm:$0x1]  ;;  %vm101_vm2 = vcmask 58368   ;;  %vm130_vm3 = vcmask 64512   ;;  %s301_s0 = smov [#allocation7]   ;;  %s191_s23 = sshll.u32 %s333_s2, 4  ;;  %s192_s23 = int_to_ptr.hbm [resolvable:$true] %s191_s23 }
   0xe   :  { %149 = vmatpush.msra.mxu2 %v42_v1  ;;  %172 = vmatpush.msra.mxu3 %v43_v0  ;;  %s189_s1 = sshll.u32 %s301_s0, 4  ;;  %vm182_vm4 = vcmask 254976   ;;  %s190_s1 = int_to_ptr.vmem [resolvable:$true] %s189_s1 }
  0x10   :  { %205 = vmatmul.msk.f32.vlgmr.msra.gmra.mxu1 %vm45_vm0, %v44_v2  ;;  %203 = vmatmul.msk.f32.vlgmr.msra.gmra.mxu0 %vm45_vm0, %v44_v2 }
  0x8d   :  { %v92_v3 = vpop.f32.mrf.mxu1  ;;  %v69_v4 = vpop.f32.mrf.mxu0 }
  0x8e   :  { %v97_v5 = vrot.slane %v92_v3, 7 }
  0x90   :  { %v99_v6 = vsel %vm98_vm1, %v97_v5, %v69_v4 }
  0x91   :  { %v102_v7 = vsel %vm101_vm2, %v99_v6, -inf }
  0x92   :  { %103 = vmax.xlane.f32.xlu0 %v102_v7 }
 0x105   :  { %v104_v8 = vpop.xlane.xlu0 %103 }
 0x106   :  { %v106_v9 = vrot.slane %v104_v8, 1  ;;  %v109_v10 = vsub.f32 %v69_v4, %v104_v8 }
 0x108   :  { %v110_v11 = vsub.f32 %v92_v3, %v106_v9  ;;  %v111_v12 = vmul.f32 1.442695, %v109_v10 }
 0x10a   :  { %v113_v13 = vmul.f32 1.442695, %v110_v11 }
 0x10c   :  { %213 = vpow2.f32 %v113_v13 }
 0x10d   :  { %215 = vpow2.f32 %v111_v12 }
 0x112   :  { %v214_v14 = vpop.eup %213 }
 0x113   :  { %v117_v15 = vrot.slane %v214_v14, 7  ;;  %v216_v16 = vpop.eup %215 }
 0x115   :  { %v118_v17 = vsel %vm98_vm1, %v117_v15, %v216_v16 }
 0x116   :  { %v120_v18 = vsel %vm101_vm2, %v118_v17, 0.0 }
 0x117   :  { %121 = vadd.xlane.f32.xlu0 %v120_v18 }
 0x18a   :  { %v122_v19 = vpop.xlane.xlu0 %121 }
 0x18b   :  { %217 = vrcp.f32 %v122_v19 }
 0x191   :  { %v218_v20 = vpop.eup %217 }
 0x192   :  { %v128_v21 = vmul.f32 %v218_v20, %v216_v16  ;;  %v125_v22 = vrot.slane %v218_v20, 1 }
 0x194   :  { %206 = vmatmul.msk.f32.vlgmr.msra.gmra.mxu2 %vm130_vm3, %v128_v21  ;;  %v129_v23 = vmul.f32 %v214_v14, %v125_v22 }
 0x196   :  { %207 = vmatmul.msk.f32.vlgmr.msra.gmra.mxu3 %vm130_vm3, %v129_v23 }
 0x217   :  { %v151_v26 = vpop.f32.mrf.mxu2 }
 0x219   :  { %v174_v24 = vpop.f32.mrf.mxu3 }
 0x21a   :  { %v179_v25 = vrot.slane %v174_v24, 7 }
 0x21c   :  { %v180_v27 = vsel %vm98_vm1, %v179_v25, %v151_v26 }
 0x21d   :  { %183 = vst.msk [vmem:[#allocation7] sm:$0x3] %vm182_vm4, %v180_v27 }
 0x21e   :  { %194 = dma.vmem_to_hbm [thread:$0]  %s190_s1, 32, %s192_s23, [#allocation4]  }
 0x21f   :  { %295 = dma.done.wait [#allocation4], 32  }
 0x220   :  { %296 = vsyncadd [#allocation4], 4294967264 }
 0x221   :  { %199 = vsyncpa [#allocation3], 1 }
 0x222   :  { %200 = vsyncpa [#allocation6], 1 }
 0x223   :  { %201 = vsyncpa [#allocation4], 1 }

</bundles_post_ra>
